<compile_context>
chip_gen: v5e
topology: v5e:2x2
jax: 0.10.0
libtpu: 0.0.40
codegen_flags: <defaults>
</compile_context>

<pallas_src>
import jax
import jax.numpy as jnp
from jax import lax
from jax.experimental import pallas as pl
from jax.experimental.pallas import tpu as pltpu


def _round_up(x: int, m: int) -> int:
    return (x + m - 1) // m * m


def _pick_tn(e_pad: int) -> int:
    # Largest lane-dense E tile (<=512) that divides the padded E.
    for cand in (512, 256, 128):
        if e_pad % cand == 0:
            return cand
    return 128  # unreachable: e_pad is always a multiple of 128


def _patch_embed_kernel(p_ref, w_ref, b_ref, o_ref):
    # p_ref: (tm, K_pad) bf16 im2col patches tile
    # w_ref: (K_pad, tn) bf16 weight tile (resident across the M sweep)
    # b_ref: (1, tn)     f32 bias tile
    # o_ref: (tm, tn)    f32 output tile
    acc = jnp.dot(p_ref[...], w_ref[...], preferred_element_type=jnp.float32)
    o_ref[...] = (acc + b_ref[...]).astype(o_ref.dtype)


def patch_embed_matmul(patches, w, b):
    """patches: (M, K) bf16, w: (K, E) bf16, b: (1, E) f32 -> (M, E) f32."""
    M, K = patches.shape
    Kw, E = w.shape
    assert Kw == K

    # Pad contraction dim and embedding dim to multiples of 128 (full-width
    # MXU passes, lane-dense output stores); pad M to a multiple of the tile.
    K_pad = _round_up(K, 128)
    E_pad = _round_up(E, 128)
    tn = _pick_tn(E_pad)
    tm = min(512, _round_up(M, 8))          # multiple of 8, v7x/v5e-safe size
    M_pad = _round_up(M, tm)

    if (M_pad, K_pad) != (M, K):
        patches = jnp.pad(patches, ((0, M_pad - M), (0, K_pad - K)))
    if (K_pad, E_pad) != (K, E):
        w = jnp.pad(w, ((0, K_pad - K), (0, E_pad - E)))
    if E_pad != E:
        b = jnp.pad(b, ((0, 0), (0, E_pad - E)))

    # Grid: E-tiles outer, M-tiles inner (fastest).  Weight/bias block indices
    # depend only on the E-tile -> stay resident in VMEM across the M sweep.
    grid = (E_pad // tn, M_pad // tm)

    cost = pl.CostEstimate(
        flops=2 * M_pad * K_pad * E_pad,
        transcendentals=0,
        bytes_accessed=(M_pad * K_pad * 2      # bf16 patches
                        + K_pad * E_pad * 2    # bf16 weight
                        + E_pad * 4            # f32 bias
                        + M_pad * E_pad * 4),  # f32 output
    )

    out = pl.pallas_call(
        _patch_embed_kernel,
        out_shape=jax.ShapeDtypeStruct((M_pad, E_pad), jnp.float32),
        grid_spec=pltpu.PrefetchScalarGridSpec(
            num_scalar_prefetch=0,
            grid=grid,
            in_specs=[
                pl.BlockSpec((tm, K_pad), lambda j, i: (i, 0)),  # patches
                pl.BlockSpec((K_pad, tn), lambda j, i: (0, j)),  # weight (resident)
                pl.BlockSpec((1, tn), lambda j, i: (0, j)),      # bias   (resident)
            ],
            out_specs=pl.BlockSpec((tm, tn), lambda j, i: (i, j)),
        ),
        compiler_params=pltpu.CompilerParams(
            dimension_semantics=("parallel", "parallel"),
            vmem_limit_bytes=32 * 1024 * 1024,
        ),
        cost_estimate=cost,
    )(patches, w, b)

    return out[:M, :E]


def image_tokenizer_forward(x, weight, bias, patch_size):
    """Reproduces ImageTokenizer.forward.

    x:      (B, C, H, W)  NCHW, float32
    weight: (E, C, p, p)  (PyTorch Conv2d weight layout)
    bias:   (E,)
    returns (B, (H//p)*(W//p), E)  with PyTorch's raw-view semantics.
    """
    B, C, H, W = x.shape
    E = weight.shape[0]
    p = patch_size
    Hp, Wp = H // p, W // p
    N = Hp * Wp
    K = C * p * p

    # --- im2col glue (plain JAX): (B, C, H, W) -> (B*N, C*p*p), cast to bf16 ---
    patches = x.reshape(B, C, Hp, p, Wp, p)
    patches = patches.transpose(0, 2, 4, 1, 3, 5)            # (B, Hp, Wp, C, p, p)
    patches = patches.reshape(B * N, K).astype(jnp.bfloat16)

    # weight (E, C, p, p) -> (K, E); matches the patch flattening order.
    w2d = weight.reshape(E, K).T.astype(jnp.bfloat16)
    b2d = bias.reshape(1, E).astype(jnp.float32)

    # --- hot path: tiled Pallas matmul on the MXU ---
    out = patch_embed_matmul(patches, w2d, b2d)              # (B*N, E) f32

    # out[b*N + n, e] == conv_nchw[b, e, hp, wp] with n = hp*Wp + wp.
    # Reproduce `conv_out.view(bs, N, -1)` exactly: PyTorch raw-views the
    # contiguous NCHW conv output (B, E, Hp, Wp) as (B, N, E).
    conv_nchw_flat = out.reshape(B, N, E).transpose(0, 2, 1)  # (B, E, N)
    result = conv_nchw_flat.reshape(B, N, E).astype(x.dtype)
    return result


if __name__ == "__main__":
    # Small shapes consistent with the module (n_channels=3 default).
    B, C, H, W = 2, 3, 16, 16
    patch_size = 8
    E = 32

    key = jax.random.PRNGKey(0)
    kx, kw, kb = jax.random.split(key, 3)

    x = jax.random.normal(kx, (B, C, H, W), dtype=jnp.float32)
    # Deterministic synthetic Conv2d parameters (shapes from nn.Conv2d).
    fan_in = C * patch_size * patch_size
    bound = 1.0 / (fan_in ** 0.5)
    weight = jax.random.uniform(
        kw, (E, C, patch_size, patch_size), dtype=jnp.float32,
        minval=-bound, maxval=bound)
    bias = jax.random.uniform(
        kb, (E,), dtype=jnp.float32, minval=-bound, maxval=bound)

    fwd = jax.jit(lambda xx, ww, bb: image_tokenizer_forward(xx, ww, bb, patch_size))
    out = jax.block_until_ready(fwd(x, weight, bias))

    # Sanity check against an XLA conv reference (same semantics as PyTorch).
    conv_ref = lax.conv_general_dilated(
        x, weight,
        window_strides=(patch_size, patch_size),
        padding="VALID",
        dimension_numbers=("NCHW", "OIHW", "NCHW"),
    ) + bias[None, :, None, None]
    Hp, Wp = H // patch_size, W // patch_size
    ref = conv_ref.reshape(B, Hp * Wp, E)   # raw view, as in PyTorch .view()

    assert out.shape == (B, Hp * Wp, E)
    # bf16 MXU inputs (f32 accumulation) -> loosened tolerance vs pure-f32.
    max_err = float(jnp.max(jnp.abs(out - ref)))
    assert jnp.allclose(out, ref, atol=2e-2, rtol=2e-2), f"max_err={max_err}"

    print("KERNEL_OK")
</pallas_src>

<mosaic_0001>
module attributes {stable_mosaic.version = 11 : i64} {
  func.func @_patch_embed_kernel(%arg0: i32, %arg1: i32, %arg2: memref<8x256xbf16, #tpu.memory_space<vmem>>, %arg3: memref<256x128xbf16, #tpu.memory_space<vmem>>, %arg4: memref<1x128xf32, #tpu.memory_space<vmem>>, %arg5: memref<8x128xf32, #tpu.memory_space<vmem>>) attributes {dimension_semantics = [#tpu.dimension_semantics<parallel>, #tpu.dimension_semantics<parallel>], iteration_bounds = array<i64: 1, 1>, scalar_prefetch = 0 : i64, scratch_operands = 0 : i64, tpu.core_type = #tpu.core_type<tc>, window_params = [{transform_indices = @transform_0, window_bounds = array<i64: 8, 256>}, {transform_indices = @transform_1, window_bounds = array<i64: 256, 128>}, {transform_indices = @transform_2, window_bounds = array<i64: 1, 128>}, {transform_indices = @transform_3, window_bounds = array<i64: 8, 128>}]} {
    %c0 = arith.constant 0 : index
    %c0_0 = arith.constant 0 : index
    %0 = vector.load %arg2[%c0, %c0_0] : memref<8x256xbf16, #tpu.memory_space<vmem>>, vector<8x256xbf16>
    %c0_1 = arith.constant 0 : index
    %c0_2 = arith.constant 0 : index
    %1 = vector.load %arg3[%c0_1, %c0_2] : memref<256x128xbf16, #tpu.memory_space<vmem>>, vector<256x128xbf16>
    %cst = arith.constant dense<0.000000e+00> : vector<8x128xf32>
    %2 = tpu.matmul %0, %1, %cst {dimension_numbers = #tpu.dot_dimension_numbers<[1], [0], [0], [1], [0, 0, 1, 1], [], []>} : vector<8x256xbf16>, vector<256x128xbf16>, vector<8x128xf32> -> vector<8x128xf32>
    %c0_3 = arith.constant 0 : index
    %c0_4 = arith.constant 0 : index
    %3 = vector.load %arg4[%c0_3, %c0_4] : memref<1x128xf32, #tpu.memory_space<vmem>>, vector<1x128xf32>
    %4 = vector.broadcast %3 : vector<1x128xf32> to vector<8x128xf32>
    %5 = arith.addf %2, %4 : vector<8x128xf32>
    %c0_5 = arith.constant 0 : index
    %c0_6 = arith.constant 0 : index
    %6 = vector.load %arg5[%c0_5, %c0_6] : memref<8x128xf32, #tpu.memory_space<vmem>>, vector<8x128xf32>
    tpu.vector_store %arg5[%c0_5, %c0_6], %5 {strides = array<i32>} : memref<8x128xf32, #tpu.memory_space<vmem>>, vector<8x128xf32>,
    return
  }
  func.func @transform_0(%arg0: i32, %arg1: i32) -> (i32, i32) {
    %c0_i32 = arith.constant 0 : i32
    %c0_i32_0 = arith.constant 0 : i32
    return %arg1, %c0_i32 : i32, i32
  }
  func.func @transform_1(%arg0: i32, %arg1: i32) -> (i32, i32) {
    %c0_i32 = arith.constant 0 : i32
    %c0_i32_0 = arith.constant 0 : i32
    return %c0_i32, %arg0 : i32, i32
  }
  func.func @transform_2(%arg0: i32, %arg1: i32) -> (i32, i32) {
    %c0_i32 = arith.constant 0 : i32
    %c0_i32_0 = arith.constant 0 : i32
    return %c0_i32, %arg0 : i32, i32
  }
  func.func @transform_3(%arg0: i32, %arg1: i32) -> (i32, i32) {
    %c0_i32 = arith.constant 0 : i32
    return %arg1, %arg0 : i32, i32
  }
}

</mosaic_0001>

<bundles_post_ra>
// kernel: _lambda_.1
= control target key start
LH: loop header
LB: loop body
LE: loop exit
PB: predicated region body
PF: predicated region fallthrough
CT: control target
= control target key end

     0   :  { %s343_s1 = inlined_call_operand.vmem [shape: bf16[256,128], index: 1, kind: input, shape index: {}]   ;;  %s344_s2 = inlined_call_operand.vmem [shape: f32[1,128], index: 2, kind: input, shape index: {}]   ;;  %s345_s0 = inlined_call_operand.vmem [shape: bf16[8,256], index: 0, kind: input, shape index: {}]   ;;  %s346_s3 = inlined_call_operand.vmem [shape: f32[8,128], index: 3, kind: output, shape index: {}]  }
   0x1   :  { %v256_v0 = vld [vmem:[%s343_s1 + $0x38] sm:$0xff]  ;;  %v255_v2 = vld [vmem:[%s343_s1 + $0x30] sm:$0xff]  ;;  %v254_v4 = vld [vmem:[%s343_s1 + $0x28] sm:$0xff] }
   0x2   :  { %v264_v1 = vld [vmem:[%s343_s1 + $0x78] sm:$0xff]  ;;  %154 = vmatpush.bf16.msra.mxu0 %v256_v0  ;;  %v263_v3 = vld [vmem:[%s343_s1 + $0x70] sm:$0xff]  ;;  %v262_v5 = vld [vmem:[%s343_s1 + $0x68] sm:$0xff] }
   0x3   :  { %167 = vmatpush.bf16.msra.mxu1 %v264_v1  ;;  %v253_v6 = vld [vmem:[%s343_s1 + $0x20] sm:$0xff]  ;;  %v252_v8 = vld [vmem:[%s343_s1 + $0x18] sm:$0xff]  ;;  %v251_v10 = vld [vmem:[%s343_s1 + $0x10] sm:$0xff] }
   0x4   :  { %v261_v7 = vld [vmem:[%s343_s1 + $0x60] sm:$0xff]  ;;  %v260_v9 = vld [vmem:[%s343_s1 + $0x58] sm:$0xff]  ;;  %v259_v11 = vld [vmem:[%s343_s1 + $0x50] sm:$0xff] }
   0x5   :  { %v250_v12 = vld [vmem:[%s343_s1 + $0x8] sm:$0xff]  ;;  %v14_v14 = vld [vmem:[%s345_s0] sm:$0xff] }
   0x6   :  { %155 = vmatpush.bf16.msra.mxu0 %v255_v2  ;;  %v258_v13 = vld [vmem:[%s343_s1 + $0x48] sm:$0xff]  ;;  %v52_v15 = vunpack.c.l.b16 %v14_v14  ;;  %v53_v16 = vunpack.c.h.b16 %v14_v14  ;;  %v249_v17 = vld [vmem:[%s343_s1] sm:$0xff] }
   0x7   :  { %168 = vmatpush.bf16.msra.mxu1 %v263_v3  ;;  %v257_v18 = vld [vmem:[%s343_s1 + $0x40] sm:$0xff] }
   0x8   :  { %v54_v19 = vpack.c.b16 %v52_v15, %v52_v15  ;;  %v55_v20 = vpack.c.b16 %v53_v16, %v53_v16  ;;  %v265_v21 = vld [vmem:[%s344_s2] ss:$0 sm:$0xff] }
   0xa   :  { %156 = vmatpush.bf16.msra.mxu0 %v254_v4 }
   0xb   :  { %169 = vmatpush.bf16.msra.mxu1 %v262_v5 }
   0xe   :  { %157 = vmatpush.bf16.msra.mxu0 %v253_v6 }
   0xf   :  { %170 = vmatpush.bf16.msra.mxu1 %v261_v7 }
  0x12   :  { %158 = vmatpush.bf16.msra.mxu0 %v252_v8 }
  0x13   :  { %171 = vmatpush.bf16.msra.mxu1 %v260_v9 }
  0x16   :  { %159 = vmatpush.bf16.msra.mxu0 %v251_v10 }
  0x17   :  { %172 = vmatpush.bf16.msra.mxu1 %v259_v11 }
  0x1a   :  { %160 = vmatpush.bf16.msra.mxu0 %v250_v12 }
  0x1b   :  { %173 = vmatpush.bf16.msra.mxu1 %v258_v13 }
  0x1e   :  { %161 = vmatpush.bf16.msra.mxu0 %v249_v17 }
  0x1f   :  { %174 = vmatpush.bf16.msra.mxu1 %v257_v18 }
  0x21   :  { %162 = vmatmul.bf16.vlgmr.msra.gmra.mxu0 %v54_v19 }
  0x22   :  { %175 = vmatmul.bf16.vlgmr.msra.gmra.mxu1 %v55_v20 }
  0x9e   :  { %v163_v22 = vpop.f32.mrf.mxu0 }
  0x9f   :  { %v176_v23 = vpop.f32.mrf.mxu1  ;;  %v164_v24 = vadd.f32 %v265_v21, %v163_v22 }
  0xa1   :  { %v177_v25 = vadd.f32 %v176_v23, %v164_v24 }
  0xa3   :  { %180 = vst [vmem:[%s346_s3] sm:$0xff] %v177_v25 }
  0xa6   :  { %v165_v26 = vpop.f32.mrf.mxu0 }
  0xa7   :  { %v178_v27 = vpop.f32.mrf.mxu1 }

</bundles_post_ra>
